<compile_context>
chip_gen: v5e
topology: v5e:2x2
jax: 0.10.0
libtpu: 0.0.40
codegen_flags: <defaults>
</compile_context>

<pallas_src>
import math

import jax
import jax.numpy as jnp
from jax.experimental import pallas as pl
from jax.experimental.pallas import tpu as pltpu

D_K = 32  # matches the global `d_k` used in the PyTorch module

_VMEM_BUDGET_BYTES = 24 * 1024 * 1024   # safe on v5e/v6e (128 MiB) and v7x (64 MiB)
_VMEM_LIMIT_BYTES = 40 * 1024 * 1024    # explicit scoped-VMEM limit, < v7x physical


def _choose_group(BH, Lq, Lk, Dk, Dv, budget_bytes=_VMEM_BUDGET_BYTES):
    """Largest divisor of BH such that the per-step working set fits VMEM."""
    bytes_in = 2 * (Lq * Dk + Lk * Dk + Lk * Dv)   # bf16 Q, K, V
    bytes_in += Lq * Lk                            # int8 mask
    bytes_out = 4 * (Lq * Dv + Lq * Lk)            # f32 context, attn
    per_head = 2 * (bytes_in + bytes_out)          # double-buffered pipeline
    per_head += 4 * Lq * Lk                        # live f32 scores
    g = max(1, budget_bytes // per_head)
    g = min(g, BH)
    if BH >= 2:
        # keep at least 2 grid steps so both v7x TensorCores get work and the
        # input/output DMAs can overlap compute.
        g = min(g, max(1, BH // 2))
    while BH % g != 0:
        g -= 1
    return g


def _attention_block(q_ref, k_ref, v_ref, mask_ref):
    # q_ref: (G, Lq, Dk) bf16, k_ref: (G, Lk, Dk) bf16, v_ref: (G, Lk, Dv) bf16
    # mask_ref: (G, Lq, Lk) int8
    scale = 1.0 / math.sqrt(D_K)

    # Fold the softmax scale into Q (Lq*Dk work instead of Lq*Lk on scores).
    q = (q_ref[...].astype(jnp.float32) * scale).astype(jnp.bfloat16)
    k = k_ref[...]
    v = v_ref[...]

    # scores = (Q / sqrt(d_k)) @ K^T — contraction on the last dims of both
    # operands, no explicit transpose; bf16 inputs, f32 MXU accumulation.
    scores = jnp.einsum("gqd,gkd->gqk", q, k, preferred_element_type=jnp.float32)

    # masked_fill_(attn_mask, -1e9)
    scores = jnp.where(mask_ref[...] != 0, jnp.float32(-1e9), scores)

    # numerically stable softmax along the key axis (all in f32)
    m = jnp.max(scores, axis=-1, keepdims=True)
    p = jnp.exp(scores - m)
    denom = jnp.sum(p, axis=-1, keepdims=True)
    attn = p * pl.reciprocal(denom, approx=True)   # EUP vrcp, otherwise idle

    # context = attn @ V (bf16 inputs, f32 accumulate)
    ctx = jnp.einsum("gqk,gkd->gqd", attn.astype(v.dtype), v,
                     preferred_element_type=jnp.float32)
    return ctx, attn


def _sdpa_kernel(q_ref, k_ref, v_ref, mask_ref, ctx_ref, attn_ref):
    ctx, attn = _attention_block(q_ref, k_ref, v_ref, mask_ref)
    ctx_ref[...] = ctx.astype(ctx_ref.dtype)
    attn_ref[...] = attn.astype(attn_ref.dtype)


def _sdpa_kernel_ctx_only(q_ref, k_ref, v_ref, mask_ref, ctx_ref):
    ctx, _ = _attention_block(q_ref, k_ref, v_ref, mask_ref)
    ctx_ref[...] = ctx.astype(ctx_ref.dtype)


def scaled_dot_product_attention(Q, K, V, attn_mask, *, return_attn=True):
    """Q: [B, H, Lq, Dk], K: [B, H, Lk, Dk], V: [B, H, Lk, Dv],
    attn_mask: [B, H, Lq, Lk] (bool/int, nonzero = masked).
    Returns (context, attn); attn is None if return_attn=False."""
    B, H, Lq, Dk = Q.shape
    Lk = K.shape[2]
    Dv = V.shape[3]
    BH = B * H

    q = Q.reshape(BH, Lq, Dk).astype(jnp.bfloat16)
    k = K.reshape(BH, Lk, Dk).astype(jnp.bfloat16)
    v = V.reshape(BH, Lk, Dv).astype(jnp.bfloat16)
    mask = attn_mask.reshape(BH, Lq, Lk).astype(jnp.int8)

    G = _choose_group(BH, Lq, Lk, Dk, Dv)
    grid = (BH // G,)

    in_specs = [
        pl.BlockSpec((G, Lq, Dk), lambda i: (i, 0, 0)),
        pl.BlockSpec((G, Lk, Dk), lambda i: (i, 0, 0)),
        pl.BlockSpec((G, Lk, Dv), lambda i: (i, 0, 0)),
        pl.BlockSpec((G, Lq, Lk), lambda i: (i, 0, 0)),
    ]
    ctx_spec = pl.BlockSpec((G, Lq, Dv), lambda i: (i, 0, 0))
    attn_spec = pl.BlockSpec((G, Lq, Lk), lambda i: (i, 0, 0))

    compiler_params = pltpu.CompilerParams(
        dimension_semantics=("parallel",),
        vmem_limit_bytes=_VMEM_LIMIT_BYTES,
    )

    if return_attn:
        ctx, attn = pl.pallas_call(
            _sdpa_kernel,
            out_shape=(
                jax.ShapeDtypeStruct((BH, Lq, Dv), jnp.float32),
                jax.ShapeDtypeStruct((BH, Lq, Lk), jnp.float32),
            ),
            grid_spec=pltpu.PrefetchScalarGridSpec(
                num_scalar_prefetch=0,
                grid=grid,
                in_specs=in_specs,
                out_specs=[ctx_spec, attn_spec],
            ),
            compiler_params=compiler_params,
        )(q, k, v, mask)
        return ctx.reshape(B, H, Lq, Dv), attn.reshape(B, H, Lq, Lk)

    ctx = pl.pallas_call(
        _sdpa_kernel_ctx_only,
        out_shape=jax.ShapeDtypeStruct((BH, Lq, Dv), jnp.float32),
        grid_spec=pltpu.PrefetchScalarGridSpec(
            num_scalar_prefetch=0,
            grid=grid,
            in_specs=in_specs,
            out_specs=ctx_spec,
        ),
        compiler_params=compiler_params,
    )(q, k, v, mask)
    return ctx.reshape(B, H, Lq, Dv), None


def _reference(Q, K, V, attn_mask):
    scores = jnp.einsum("bhqd,bhkd->bhqk", Q, K) / math.sqrt(D_K)
    scores = jnp.where(attn_mask, -1e9, scores)
    attn = jax.nn.softmax(scores, axis=-1)
    context = jnp.einsum("bhqk,bhkd->bhqd", attn, V)
    return context, attn


if __name__ == "__main__":
    key = jax.random.PRNGKey(0)
    kq, kk, kv = jax.random.split(key, 3)

    B, H, Lq, Lk, Dk, Dv = 2, 2, 8, 8, D_K, D_K

    Q = jax.random.normal(kq, (B, H, Lq, Dk), dtype=jnp.float32)
    K = jax.random.normal(kk, (B, H, Lk, Dk), dtype=jnp.float32)
    V = jax.random.normal(kv, (B, H, Lk, Dv), dtype=jnp.float32)
    # padding-style mask: last 2 key positions masked for every query
    attn_mask = jnp.zeros((B, H, Lq, Lk), dtype=bool).at[..., -2:].set(True)

    ctx_ref, attn_ref = _reference(Q, K, V, attn_mask)

    # Full path (matches the PyTorch module: returns both context and attn).
    context, attn = scaled_dot_product_attention(Q, K, V, attn_mask)
    context = jax.block_until_ready(context)
    attn = jax.block_until_ready(attn)

    # bf16 matmuls + approx reciprocal => slightly looser tolerance than pure f32.
    assert jnp.allclose(context, ctx_ref, atol=2e-2, rtol=2e-2)
    assert jnp.allclose(attn, attn_ref, atol=2e-2, rtol=2e-2)

    # Context-only path (skips the O(L^2) attention-probabilities writeback).
    ctx_only, none_attn = scaled_dot_product_attention(
        Q, K, V, attn_mask, return_attn=False)
    ctx_only = jax.block_until_ready(ctx_only)
    assert none_attn is None
    assert jnp.allclose(ctx_only, ctx_ref, atol=2e-2, rtol=2e-2)

    print("KERNEL_OK")
</pallas_src>

<mosaic_0001>
module attributes {stable_mosaic.version = 11 : i64} {
  func.func @_sdpa_kernel(%arg0: i32, %arg1: memref<2x8x32xbf16, #tpu.memory_space<vmem>>, %arg2: memref<2x8x32xbf16, #tpu.memory_space<vmem>>, %arg3: memref<2x8x32xbf16, #tpu.memory_space<vmem>>, %arg4: memref<2x8x8xi8, #tpu.memory_space<vmem>>, %arg5: memref<2x8x32xf32, #tpu.memory_space<vmem>>, %arg6: memref<2x8x8xf32, #tpu.memory_space<vmem>>) attributes {dimension_semantics = [#tpu.dimension_semantics<parallel>], iteration_bounds = array<i64: 2>, scalar_prefetch = 0 : i64, scratch_operands = 0 : i64, tpu.core_type = #tpu.core_type<tc>, window_params = [{transform_indices = @transform_0, window_bounds = array<i64: 2, 8, 32>}, {transform_indices = @transform_1, window_bounds = array<i64: 2, 8, 32>}, {transform_indices = @transform_2, window_bounds = array<i64: 2, 8, 32>}, {transform_indices = @transform_3, window_bounds = array<i64: 2, 8, 8>}, {transform_indices = @transform_4, window_bounds = array<i64: 2, 8, 32>}, {transform_indices = @transform_5, window_bounds = array<i64: 2, 8, 8>}]} {
    %c0 = arith.constant 0 : index
    %c0_0 = arith.constant 0 : index
    %c0_1 = arith.constant 0 : index
    %0 = vector.load %arg1[%c0, %c0_0, %c0_1] : memref<2x8x32xbf16, #tpu.memory_space<vmem>>, vector<2x8x32xbf16>
    %1 = arith.extf %0 : vector<2x8x32xbf16> to vector<2x8x32xf32>
    %cst = arith.constant 0.176776692 : f32
    %2 = vector.broadcast %cst : f32 to vector<2x8x32xf32>
    %3 = arith.mulf %1, %2 : vector<2x8x32xf32>
    %4 = arith.truncf %3 : vector<2x8x32xf32> to vector<2x8x32xbf16>
    %c0_2 = arith.constant 0 : index
    %c0_3 = arith.constant 0 : index
    %c0_4 = arith.constant 0 : index
    %5 = vector.load %arg2[%c0_2, %c0_3, %c0_4] : memref<2x8x32xbf16, #tpu.memory_space<vmem>>, vector<2x8x32xbf16>
    %c0_5 = arith.constant 0 : index
    %c0_6 = arith.constant 0 : index
    %c0_7 = arith.constant 0 : index
    %6 = vector.load %arg3[%c0_5, %c0_6, %c0_7] : memref<2x8x32xbf16, #tpu.memory_space<vmem>>, vector<2x8x32xbf16>
    "tpu.trace_start"() <{level = 10 : i32, message = "gqd,gkd->gqk"}> : () -> ()
    %cst_8 = arith.constant dense<0.000000e+00> : vector<2x8x8xf32>
    %7 = tpu.matmul %4, %5, %cst_8 {dimension_numbers = #tpu.dot_dimension_numbers<[2], [2], [1], [1], [0, 0, 0, 1, 1, 1], [0], [0]>} : vector<2x8x32xbf16>, vector<2x8x32xbf16>, vector<2x8x8xf32> -> vector<2x8x8xf32>
    "tpu.trace_stop"() : () -> ()
    %c0_9 = arith.constant 0 : index
    %c0_10 = arith.constant 0 : index
    %c0_11 = arith.constant 0 : index
    %8 = vector.load %arg4[%c0_9, %c0_10, %c0_11] : memref<2x8x8xi8, #tpu.memory_space<vmem>>, vector<2x8x8xi8>
    %c0_i8 = arith.constant 0 : i8
    %9 = vector.broadcast %c0_i8 : i8 to vector<2x8x8xi8>
    %10 = arith.cmpi ne, %8, %9 : vector<2x8x8xi8>
    %cst_12 = arith.constant -1.000000e+09 : f32
    %11 = vector.broadcast %cst_12 : f32 to vector<2x8x8xf32>
    %12 = arith.select %10, %11, %7 : vector<2x8x8xi1>, vector<2x8x8xf32>
    %cst_13 = arith.constant dense<0xFF800000> : vector<2x8xf32>
    %13 = vector.multi_reduction <maximumf>, %12, %cst_13 [2] : vector<2x8x8xf32> to vector<2x8xf32>
    %14 = vector.shape_cast %13 : vector<2x8xf32> to vector<2x8x1xf32>
    %15 = vector.broadcast %14 : vector<2x8x1xf32> to vector<2x8x8xf32>
    %16 = arith.subf %12, %15 : vector<2x8x8xf32>
    %17 = math.exp %16 : vector<2x8x8xf32>
    %cst_14 = arith.constant dense<0.000000e+00> : vector<2x8xf32>
    %18 = vector.multi_reduction <add>, %17, %cst_14 [2] : vector<2x8x8xf32> to vector<2x8xf32>
    %19 = vector.shape_cast %18 : vector<2x8xf32> to vector<2x8x1xf32>
    %20 = tpu.reciprocal %19 {approx = true} : vector<2x8x1xf32> -> vector<2x8x1xf32>
    %21 = vector.broadcast %20 : vector<2x8x1xf32> to vector<2x8x8xf32>
    %22 = arith.mulf %17, %21 : vector<2x8x8xf32>
    %23 = arith.truncf %22 : vector<2x8x8xf32> to vector<2x8x8xbf16>
    "tpu.trace_start"() <{level = 10 : i32, message = "gqk,gkd->gqd"}> : () -> ()
    %cst_15 = arith.constant dense<0.000000e+00> : vector<2x8x32xf32>
    %24 = tpu.matmul %23, %6, %cst_15 {dimension_numbers = #tpu.dot_dimension_numbers<[2], [1], [1], [2], [0, 0, 0, 1, 1, 2], [0], [0]>} : vector<2x8x8xbf16>, vector<2x8x32xbf16>, vector<2x8x32xf32> -> vector<2x8x32xf32>
    "tpu.trace_stop"() : () -> ()
    %c0_16 = arith.constant 0 : index
    %c0_17 = arith.constant 0 : index
    %c0_18 = arith.constant 0 : index
    %25 = vector.load %arg5[%c0_16, %c0_17, %c0_18] : memref<2x8x32xf32, #tpu.memory_space<vmem>>, vector<2x8x32xf32>
    tpu.vector_store %arg5[%c0_16, %c0_17, %c0_18], %24 {strides = array<i32>} : memref<2x8x32xf32, #tpu.memory_space<vmem>>, vector<2x8x32xf32>,
    %c0_19 = arith.constant 0 : index
    %c0_20 = arith.constant 0 : index
    %c0_21 = arith.constant 0 : index
    %26 = vector.load %arg6[%c0_19, %c0_20, %c0_21] : memref<2x8x8xf32, #tpu.memory_space<vmem>>, vector<2x8x8xf32>
    tpu.vector_store %arg6[%c0_19, %c0_20, %c0_21], %22 {strides = array<i32>} : memref<2x8x8xf32, #tpu.memory_space<vmem>>, vector<2x8x8xf32>,
    return
  }
  func.func @transform_0(%arg0: i32) -> (i32, i32, i32) {
    %c0_i32 = arith.constant 0 : i32
    %c0_i32_0 = arith.constant 0 : i32
    %c0_i32_1 = arith.constant 0 : i32
    return %arg0, %c0_i32, %c0_i32_0 : i32, i32, i32
  }
  func.func @transform_1(%arg0: i32) -> (i32, i32, i32) {
    %c0_i32 = arith.constant 0 : i32
    %c0_i32_0 = arith.constant 0 : i32
    %c0_i32_1 = arith.constant 0 : i32
    return %arg0, %c0_i32, %c0_i32_0 : i32, i32, i32
  }
  func.func @transform_2(%arg0: i32) -> (i32, i32, i32) {
    %c0_i32 = arith.constant 0 : i32
    %c0_i32_0 = arith.constant 0 : i32
    %c0_i32_1 = arith.constant 0 : i32
    return %arg0, %c0_i32, %c0_i32_0 : i32, i32, i32
  }
  func.func @transform_3(%arg0: i32) -> (i32, i32, i32) {
    %c0_i32 = arith.constant 0 : i32
    %c0_i32_0 = arith.constant 0 : i32
    %c0_i32_1 = arith.constant 0 : i32
    return %arg0, %c0_i32, %c0_i32_0 : i32, i32, i32
  }
  func.func @transform_4(%arg0: i32) -> (i32, i32, i32) {
    %c0_i32 = arith.constant 0 : i32
    %c0_i32_0 = arith.constant 0 : i32
    %c0_i32_1 = arith.constant 0 : i32
    return %arg0, %c0_i32, %c0_i32_0 : i32, i32, i32
  }
  func.func @transform_5(%arg0: i32) -> (i32, i32, i32) {
    %c0_i32 = arith.constant 0 : i32
    %c0_i32_0 = arith.constant 0 : i32
    %c0_i32_1 = arith.constant 0 : i32
    return %arg0, %c0_i32, %c0_i32_0 : i32, i32, i32
  }
}

</mosaic_0001>

<bundles_post_ra>
// kernel: tpu_custom_call.1
= control target key start
LH: loop header
LB: loop body
LE: loop exit
PB: predicated region body
PF: predicated region fallthrough
CT: control target
= control target key end

     0   :  { %s1379_s0 = inlined_call_operand.hbm [shape: bf16[4,8,32], index: 0, kind: input, shape index: {}]   ;;  %s1380_s1 = inlined_call_operand.hbm [shape: bf16[4,8,32], index: 1, kind: input, shape index: {}]   ;;  %s1381_s2 = inlined_call_operand.hbm [shape: bf16[4,8,32], index: 2, kind: input, shape index: {}]   ;;  %s1382_s3 = inlined_call_operand.hbm [shape: s8[4,8,8], index: 3, kind: input, shape index: {}]   ;;  %s1383_s4 = inlined_call_operand.hbm [shape: f32[4,8,32], index: 4, kind: output, shape index: {0}]   ;;  %s1384_s5 = inlined_call_operand.hbm [shape: f32[4,8,8], index: 5, kind: output, shape index: {1}]  }
   0x1   :  { %1391 = sst [smem:[#allocation22_spill]] %s1379_s0 }
   0x2   :  { %1392 = sst [smem:[#allocation23_spill]] %s1380_s1 }
   0x3   :  { %11 = vsyncpa [#allocation3], 0 }
   0x4   :  { %13 = vsyncpa [#allocation3 + $0x1], 0 }
   0x5   :  { %14 = vsyncpa [#allocation6], 0 }
   0x6   :  { %16 = vsyncpa [#allocation6 + $0x1], 0 }
   0x7   :  { %17 = vsyncpa [#allocation9], 0 }
   0x8   :  { %19 = vsyncpa [#allocation9 + $0x1], 0 }
   0x9   :  { %20 = vsyncpa [#allocation4], 0 }
   0xa   :  { %22 = vsyncpa [#allocation4 + $0x1], 0 }
   0xb   :  { %23 = vsyncpa [#allocation12], 0 }
   0xc   :  { %25 = vsyncpa [#allocation12 + $0x1], 0  ;;  %s1119_s18 = smov 0   ;;  %s1121_s19 = smov 0  }
   0xd   :  { %s1123_s20 = smov 0   ;;  %s1125_s21 = smov 0  }
   0xe LB: > { %1393 = sst [smem:[#allocation18_spill]] %s1076_s20  ;;  %s1140_s22 = sadd.s32 4294967295, %s1080_s21   ;;  %s1080_s21 = sphi %s1125_s21, %s1406_s21   ;;  %s1076_s20 = sphi %s1123_s20, %s1408_s20   ;;  %s1072_s19 = sphi %s1121_s19, %s1410_s19   ;;  %s1068_s18 = sphi %s1119_s18, %s1409_s18  }
   0xf   : > { %s729_s23 = sadd.s32 4294967294, %s1080_s21   ;;  %s1144_s24 = sadd.s32 1, %s1080_s21  }
  0x10   : > { %1394 = sst [smem:[#allocation19_spill]] %s1144_s24  ;;  %s38_s25 = sadd.s32 1, %s1076_s20 }
  0x11   : > { %s35_s26 = ssub.s32 %s1080_s21, %s1144_s24  ;;  %p45_p0 = scmp.ne.s32.totalorder %s1076_s20, %s1072_s19 }
  0x12   : > { %p36_p1 = scmp.eq.s32.totalorder %s35_s26, 0  ;;  %p46_p2 = scmp.eq.s32.totalorder %s1080_s21, 0 }
  0x13   : > { %p51_p3 = scmp.ne.s32.totalorder %s1072_s19, %s1068_s18  ;;  %p52_p4 = scmp.eq.s32.totalorder %s1140_s22, 0 }
  0x14   : > { %s1156_s27 = scalar_select %p36_p1, %s1076_s20, %s38_s25  }
  0x15   : > { %p47_p5 = por %p46_p2, %p45_p0  ;;  %p1158_p6 = por %p52_p4, %p51_p3 }
  0x16   : > { %1395 = sst [smem:[#allocation20_spill]] %s1156_s27  ;;  %p153_p7 = scmp.eq.s32.totalorder %s1140_s22, 1 }
  0x17   : > { %p159_p8 = scmp.eq.s32.totalorder %s729_s23, 1  ;;  %p731_p9 = scmp.ge.s32.totalorder %s1080_s21, 2 }
  0x18   : > { %p805_p10 = scmp.lt.s32.totalorder %s1080_s21, 2  ;;  %p1165_p11 = por %p153_p7, %p45_p0 }
  0x19   : > { %p1169_p12 = por %p159_p8, %p51_p3  ;;  %s1174_s6 = sand.u32 1, %s1076_s20  }
  0x1a   : > { %s1177_s7 = sshll.u32 %s1080_s21, 3  ;;  %s1180_s8 = sshll.u32 %s1174_s6, 3 }
  0x1b   : > { %s1398_s30 = scalar_select %p1169_p12, 1, 0 }
  0x1c   : > { %p1182_p13 = pnand %p805_p10, %p47_p5  ;;  %s227_s10 = sand.u32 1, %s1080_s21  }
  0x1d   : > { %1399 = sst [smem:[#allocation21_spill]] %s1398_s30  ;;  %s231_s14 = scalar_lea.vmem [#allocation5], %s1180_s8 }
  0x1e   : > { %s1401_s1 = sld [smem:[#allocation23_spill]]  ;;  %s239_s15 = sshll.u32 %s231_s14, 4  ;;  %s240_s15 = int_to_ptr.vmem [resolvable:$true] %s239_s15 }
  0x1f   : > { %p744_p0 = scmp.ge.s32.totalorder %s1080_s21, 1  ;;  %s1193_s17 = scalar_lea.sflag [#allocation6], %s227_s10 }
  0x20   : > { %p858_p2 = pneg %p1182_p13 }
  0x24   : > { %s236_s13 = scalar_lea.hbm %s1401_s1, %s1177_s7  ;;  %s861_s12 = scalar_lea.hbm %s1401_s1, 16 }
  0x25   : > { %s237_s16 = sshll.u32 %s236_s13, 4  ;;  %s238_s16 = int_to_ptr.hbm [resolvable:$true] %s237_s16 }
  0x26   : > { %s854_s23 = sshra.s32 %s238_s16, 4  ;;  %s855_s23 = int_to_ptr.hbm [resolvable:$true] %s854_s23 }
  0x27   : > { %s856_s25 = scalar_lea.hbm %s855_s23, 8  ;;  %p862_p5 = scmp.lt.s32.totalorder %s855_s23, %s1401_s1 }
  0x28   : > { %p857_p1 = scmp.ne.s32.totalorder %s855_s23, %s856_s25  ;;  %p863_p7 = scmp.lt.s32.totalorder %s861_s12, %s856_s25 }
  0x2a   : > { %p859_p3 = pnand %p858_p2, %p857_p1  ;;  %p864_p8 = por %p863_p7, %p862_p5 }
  0x2c   : > { %p860_p4 = pneg %p859_p3 }
  0x2e   : > { %p865_p10 = pnand %p864_p8, %p860_p4 }
  0x30   : > { %868 = shalt.err (!%p865_p10)
}
  0x31   : > { %s1388_s10 = smov 64   ;;  %s1083_s27 = smov 4  }
  0x32   : > { %791 = dma.hbm_to_vmem [thread:$0]  (!%p1182_p13), %s238_s16, 128, %s240_s15, %s1193_s17, %s1388_s10, %s1388_s10, %s1083_s27  }
  0x33   : > { %p291_p1 = scmp.lt.s32.totalorder %s1080_s21, 3  ;;  %s1402_s0 = sld [smem:[#allocation22_spill]] }
  0x34   : > { %s209_s13 = scalar_lea.vmem [#allocation2], %s1180_s8  ;;  %s206_s1 = scalar_lea.sflag [#allocation3], %s1174_s6 }
  0x35   : > { %p1219_p3 = pnand %p744_p0, %p291_p1  ;;  %s217_s14 = sshll.u32 %s209_s13, 4  ;;  %s218_s14 = int_to_ptr.vmem [resolvable:$true] %s217_s14 }
  0x39   : > { %s214_s26 = scalar_lea.hbm %s1402_s0, %s1177_s7  ;;  %s891_s23 = scalar_lea.hbm %s1402_s0, 16 }
  0x3a   : > { %s215_s12 = sshll.u32 %s214_s26, 4  ;;  %s216_s12 = int_to_ptr.hbm [resolvable:$true] %s215_s12 }
  0x3b   : > { %s884_s20 = sshra.s32 %s216_s12, 4  ;;  %s885_s20 = int_to_ptr.hbm [resolvable:$true] %s884_s20 }
  0x3c   : > { %s886_s24 = scalar_lea.hbm %s885_s20, 8  ;;  %p892_p0 = scmp.lt.s32.totalorder %s885_s20, %s1402_s0 }
  0x3d   : > { %p887_p4 = scmp.ne.s32.totalorder %s885_s20, %s886_s24  ;;  %p893_p8 = scmp.lt.s32.totalorder %s891_s23, %s886_s24 }
  0x3f   : > { %p889_p5 = pnand %p887_p4, %p858_p2  ;;  %p894_p10 = por %p893_p8, %p892_p0 }
  0x41   : > { %p890_p7 = pneg %p889_p5 }
  0x43   : > { %p895_p1 = pnand %p894_p10, %p890_p7 }
  0x45   : > { %898 = shalt.err (!%p895_p1)
}
  0x46   : > { %s1404_s26 = smov 64   ;;  %s258_s16 = scalar_lea.hbm %s1381_s2, %s1177_s7 }
  0x47   : > { %788 = dma.hbm_to_vmem [thread:$0]  (!%p1182_p13), %s216_s12, 128, %s218_s14, %s206_s1, %s1404_s26, %s1404_s26, %s1083_s27  }
  0x48   : > { %s253_s30 = scalar_lea.vmem [#allocation7], %s1180_s8  ;;  %s259_s20 = sshll.u32 %s258_s16, 4  ;;  %s260_s20 = int_to_ptr.hbm [resolvable:$true] %s259_s20 }
  0x49   : > { %s261_s10 = sshll.u32 %s253_s30, 4  ;;  %s914_s24 = sshra.s32 %s260_s20, 4  ;;  %s262_s10 = int_to_ptr.vmem [resolvable:$true] %s261_s10  ;;  %s915_s24 = int_to_ptr.hbm [resolvable:$true] %s914_s24 }
  0x4a   : > { %s916_s23 = scalar_lea.hbm %s915_s24, 8  ;;  %s921_s1 = scalar_lea.hbm %s1381_s2, 16 }
  0x4b   : > { %p917_p4 = scmp.ne.s32.totalorder %s915_s24, %s916_s23  ;;  %p922_p0 = scmp.lt.s32.totalorder %s915_s24, %s1381_s2 }
  0x4c   : > { %p923_p8 = scmp.lt.s32.totalorder %s921_s1, %s916_s23 }
  0x4d   : > { %p919_p5 = pnand %p917_p4, %p858_p2 }
  0x4e   : > { %p924_p10 = por %p923_p8, %p922_p0 }
  0x4f   : > { %p920_p7 = pneg %p919_p5 }
  0x51   : > { %p925_p1 = pnand %p924_p10, %p920_p7 }
  0x53   : > { %928 = shalt.err (!%p925_p1)
}
  0x54   : > { %794 = dma.hbm_to_vmem [thread:$0]  (!%p1182_p13), %s260_s20, 128, %s262_s10, %s1193_s17, %s1404_s26, %s1404_s26, %s1083_s27  }
  0x55   : > { %s741_s0 = sshll.u32 %s1174_s6, 2  ;;  %s766_s30 = sshll.u32 %s1080_s21, 2 }
  0x56   : > { %s280_s13 = scalar_lea.hbm %s1382_s3, %s766_s30  ;;  %s275_s16 = scalar_lea.vmem [#allocation8], %s741_s0 }
  0x57   : > { %s281_s15 = sshll.u32 %s280_s13, 4  ;;  %s283_s24 = sshll.u32 %s275_s16, 4  ;;  %s282_s15 = int_to_ptr.hbm [resolvable:$true] %s281_s15  ;;  %s284_s24 = int_to_ptr.vmem [resolvable:$true] %s283_s24 }
  0x58   : > { %s272_s23 = scalar_lea.sflag [#allocation9], %s1174_s6  ;;  %s944_s25 = sshra.s32 %s282_s15, 4  ;;  %s945_s25 = int_to_ptr.hbm [resolvable:$true] %s944_s25 }
  0x59   : > { %s946_s1 = scalar_lea.hbm %s945_s25, 4  ;;  %s951_s26 = scalar_lea.hbm %s1382_s3, 8 }
  0x5a   : > { %p947_p4 = scmp.ne.s32.totalorder %s945_s25, %s946_s1  ;;  %p952_p0 = scmp.lt.s32.totalorder %s945_s25, %s1382_s3 }
  0x5b   : > { %p953_p8 = scmp.lt.s32.totalorder %s951_s26, %s946_s1 }
  0x5c   : > { %p949_p5 = pnand %p947_p4, %p858_p2 }
  0x5d   : > { %p954_p10 = por %p953_p8, %p952_p0 }
  0x5e   : > { %p950_p7 = pneg %p949_p5 }
  0x60   : > { %p955_p1 = pnand %p954_p10, %p950_p7 }
  0x62   : > { %958 = shalt.err (!%p955_p1)
}
  0x63   : > { %s1084_s6 = smov 32   ;;  %s1085_s12 = smov 2  }
  0x64   : > { %797 = dma.hbm_to_vmem [thread:$0]  (!%p1182_p13), %s282_s15, 64, %s284_s24, %s272_s23, %s1084_s6, %s1084_s6, %s1085_s12  }
  0x65   : > { %295 = sbr.rel (%p1219_p3) target bundleno = 653 (0x28d), region = 36  ;;  %s1279_s14 = sand.u32 (!%p1219_p3), 1, %s1072_s19  }
  0x66   : > { %s1282_s0 = sshll.u32 (!%p1219_p3), %s1279_s14, 3  ;;  %s298_s30 = scalar_lea.sflag (!%p1219_p3), [#allocation3], %s1279_s14 }
  0x67   : > { %s301_s7 = scalar_lea.vmem (!%p1219_p3), [#allocation2], %s1282_s0 }
  0x6a   : > { %1047 = dma.done.wait (%p1158_p6), %s298_s30, 128  }
  0x6b   : > { %1049 = vsyncadd (%p1158_p6), %s298_s30, 4294967168  ;;  %s307_s9 = sand.u32 1, %s1140_s22   ;;  %s311_s8 = scalar_lea.vmem [#allocation5], %s1282_s0 }
  0x6c   : > { %s308_s11 = scalar_lea.sflag [#allocation6], %s307_s9 }
  0x6d   : > { %1051 = dma.done.wait (%p1158_p6), %s308_s11, 256  }
  0x6e   : > { %1053 = vsyncadd (%p1158_p6), %s308_s11, 4294967040  ;;  %s748_s13 = sshll.u32 %s1279_s14, 2  ;;  %s321_s15 = scalar_lea.vmem [#allocation7], %s1282_s0 }
  0x6f   : > { %s328_s16 = scalar_lea.sflag [#allocation9], %s1279_s14  ;;  %s331_s24 = scalar_lea.vmem [#allocation8], %s748_s13 }
  0x70   : > { %1055 = dma.done.wait (%p1158_p6), %s328_s16, 64  }
  0x71   : > { %1057 = vsyncadd (%p1158_p6), %s328_s16, 4294967232  ;;  %vm400_vm0 = vcmask 261120   ;;  %v396_v0 = vld [vmem:[%s311_s8] sm:$0xf]  ;;  %v397_v1 = vld [vmem:[%s311_s8 + $0x4] sm:$0xf] }
  0x72   : > { %v770_v2 = vld [vmem:[%s301_s7] sm:$0xff]   ;;  %v405_v3 = vsel %vm400_vm0, %v396_v0, 0  ;;  %v424_v4 = vsel %vm400_vm0, %v397_v1, 0  ;;  %v439_v11 = vld [vmem:[%s331_s24] sm:$0x3]  ;;  %v1086_v13 = vmov 0  }
  0x73   : > { %v771_v5 = vunpack.c.l.bf16 %v770_v2  ;;  %v772_v6 = vunpack.c.h.bf16 %v770_v2  ;;  %414 = vmatpush.bf16.xpose.msra.mxu0 %v405_v3  ;;  %433 = vmatpush.bf16.xpose.msra.mxu1 %v424_v4  ;;  %vm441_vm1 = vnez %v439_v11  ;;  %v440_v12 = vld [vmem:[%s331_s24 + $0x2] sm:$0x3]  ;;  %vm451_vm4 = vcmask 64512   ;;  %v398_v36 = vld [vmem:[%s321_s15] sm:$0xf]  ;;  %s749_s28 = sshll.u32 %s1279_s14, 4 }
  0x74   : > { %v443_v14 = vsel %vm441_vm1, 16843009, %v1086_v13  ;;  %vm442_vm2 = vnez %v440_v12  ;;  %vm479_vm6 = vcmask 1043456   ;;  %v399_v38 = vld [vmem:[%s321_s15 + $0x4] sm:$0xf]  ;;  %s378_s23 = scalar_lea.vmem [#allocation11], %s749_s28 }
  0x75   : > { %v392_v7 = vmul.f32 0.17677669, %v771_v5  ;;  %v393_v8 = vmul.f32 0.17677669, %v772_v6  ;;  %v445_v15 = vunpack.c.0.s8 %v443_v14  ;;  %v444_v16 = vsel %vm442_vm2, 16843009, %v1086_v13 }
  0x76   : > { %v446_v17 = vunpack.c.0.s8 %v444_v16  ;;  %v481_v37 = vsel %vm479_vm6, %v398_v36, 0  ;;  %v500_v39 = vsel %vm479_vm6, %v399_v38, 0  ;;  %s554_s25 = sshll.u32 %s378_s23, 4  ;;  %s767_s1 = sshll.u32 %s1140_s22, 4  ;;  %s555_s25 = int_to_ptr.vmem [resolvable:$true] %s554_s25 }
  0x77   : > { %v394_v9 = vpack.c.bf16 %v392_v7, %v392_v7  ;;  %v395_v10 = vpack.c.bf16 %v393_v8, %v393_v8  ;;  %vm447_vm3 = vcmp.ne.s32.totalorder %v445_v15, 0  ;;  %490 = vmatpush.bf16.msra.mxu2 %v481_v37  ;;  %509 = vmatpush.bf16.msra.mxu3 %v500_v39  ;;  %s553_s26 = scalar_lea.hbm %s1384_s5, %s767_s1  ;;  %s525_s20 = scalar_lea.sflag [#allocation12], %s1279_s14 }
  0x78   : > { %vm448_vm5 = vcmp.ne.s32.totalorder %v446_v17, 0  ;;  %s556_s10 = sshll.u32 %s553_s26, 4  ;;  %s994_s7 = scalar_lea.hbm %s1384_s5, 32  ;;  %s557_s10 = int_to_ptr.hbm [resolvable:$true] %s556_s10 }
  0x79   : > { %s988_s6 = sshra.s32 %s557_s10, 4  ;;  %s989_s6 = int_to_ptr.hbm [resolvable:$true] %s988_s6 }
  0x7a   : > { %751 = vmatmul.msk.bf16.vlgmr.msra.gmra.mxu0 %vm400_vm0, %v394_v9  ;;  %752 = vmatmul.msk.bf16.vlgmr.msra.gmra.mxu1 %vm400_vm0, %v395_v10  ;;  %s990_s12 = scalar_lea.hbm %s989_s6, 16  ;;  %p995_p3 = scmp.lt.s32.totalorder %s989_s6, %s1384_s5 }
  0x7b   : > { %p991_p6 = scmp.ne.s32.totalorder %s989_s6, %s990_s12  ;;  %p996_p4 = scmp.lt.s32.totalorder %s994_s7, %s990_s12 }
  0x7d   : > { %p992_p13 = pnand %p991_p6, %p1165_p11  ;;  %p997_p5 = por %p996_p4, %p995_p3 }
  0x7f   : > { %p993_p2 = pneg %p992_p13 }
  0x81   : > { %p998_p7 = pnand %p997_p5, %p993_p2 }
  0xf7   : > { %v416_v18 = vpop.f32.mrf.mxu0  ;;  %v435_v19 = vpop.f32.mrf.mxu1 }
  0xf8   : > { %v449_v20 = vsel %vm447_vm3, -1e+09, %v416_v18  ;;  %v450_v22 = vsel %vm448_vm5, -1e+09, %v435_v19 }
  0xf9   : > { %v452_v21 = vsel %vm451_vm4, %v449_v20, -inf  ;;  %v455_v25 = vsel %vm451_vm4, %v450_v22, -inf }
  0xfa   : > { %453 = vmax.xlane.f32.xlu0 %v452_v21 }
  0xff   : > { %v418_v23 = vpop.f32.mrf.mxu0  ;;  %v437_v24 = vpop.f32.mrf.mxu1 }
 0x102   : > { %456 = vmax.xlane.f32.xlu0 %v455_v25 }
 0x16d   : > { %v454_v26 = vpop.xlane.xlu0 %453 }
 0x16e   : > { %v458_v27 = vsub.f32 %v449_v20, %v454_v26 }
 0x170   : > { %v460_v28 = vmul.f32 1.442695, %v458_v27 }
 0x172   : > { %846 = vpow2.f32 %v460_v28 }
 0x175   : > { %v457_v29 = vpop.xlane.xlu0 %456 }
 0x176   : > { %v459_v30 = vsub.f32 %v450_v22, %v457_v29 }
 0x178   : > { %v847_v31 = vpop.eup %846  ;;  %v462_v32 = vmul.f32 1.442695, %v459_v30 }
 0x179   : > { %v464_v33 = vsel %vm451_vm4, %v847_v31, 0.0 }
 0x17a   : > { %848 = vpow2.f32 %v462_v32  ;;  %465 = vadd.xlane.f32.xlu1 %v464_v33 }
 0x180   : > { %v849_v34 = vpop.eup %848 }
 0x181   : > { %v467_v35 = vsel %vm451_vm4, %v849_v34, 0.0 }
 0x182   : > { %468 = vadd.xlane.f32.xlu1 %v467_v35 }
 0x1ed   : > { %v466_v40 = vpop.xlane.xlu1 %465 }
 0x1ee   : > { %850 = vrcp.f32 %v466_v40 }
 0x1f4   : > { %v851_v41 = vpop.eup %850 }
 0x1f5   : > { %v469_v42 = vpop.xlane.xlu1 %468  ;;  %v472_v43 = vmul.f32 %v851_v41, %v847_v31 }
 0x1f6   : > { %852 = vrcp.f32 %v469_v42 }
 0x1f7   : > { %v474_v44 = vpack.c.bf16 %v472_v43, %v472_v43  ;;  %517 = vst.msk [vmem:[%s378_s23] sm:$0xff] %vm451_vm4, %v472_v43 }
 0x1f9   : > { %753 = vmatmul.msk.bf16.vlgmr.msra.gmra.mxu2 %vm451_vm4, %v474_v44 }
 0x1fc   : > { %v853_v45 = vpop.eup %852 }
 0x1fd   : > { %v473_v46 = vmul.f32 %v853_v45, %v849_v34 }
 0x1ff   : > { %v475_v47 = vpack.c.bf16 %v473_v46, %v473_v46  ;;  %518 = vst.msk [vmem:[%s378_s23 + $0x8] sm:$0xff] %vm451_vm4, %v473_v46 }
 0x201   : > { %754 = vmatmul.msk.bf16.vlgmr.msra.gmra.mxu3 %vm451_vm4, %v475_v47 }
 0x202   : > { %1001 = shalt.err (!%p998_p7)
}
 0x203   : > { %s1087_s11 = smov 128   ;;  %s1088_s8 = smov 8  }
 0x204   : > { %782 = dma.vmem_to_hbm [thread:$0]  (%p1165_p11), %s555_s25, 256, %s557_s10, %s525_s20, %s1087_s11, %s1087_s11, %s1088_s8  }
 0x205   : > { %s371_s13 = scalar_lea.vmem [#allocation10], %s749_s28  ;;  %s536_s24 = scalar_lea.hbm %s1383_s4, %s767_s1 }
 0x206   : > { %s537_s23 = sshll.u32 %s371_s13, 4  ;;  %s539_s27 = sshll.u32 %s536_s24, 4  ;;  %s538_s23 = int_to_ptr.vmem [resolvable:$true] %s537_s23  ;;  %s540_s27 = int_to_ptr.hbm [resolvable:$true] %s539_s27 }
 0x207   : > { %s520_s17 = scalar_lea.sflag [#allocation4], %s1279_s14  ;;  %s1016_s25 = sshra.s32 %s540_s27, 4  ;;  %s1017_s25 = int_to_ptr.hbm [resolvable:$true] %s1016_s25 }
 0x208   : > { %s1018_s26 = scalar_lea.hbm %s1017_s25, 16  ;;  %s1022_s1 = scalar_lea.hbm %s1383_s4, 32 }
 0x209   : > { %p1019_p0 = scmp.ne.s32.totalorder %s1017_s25, %s1018_s26  ;;  %p1023_p1 = scmp.lt.s32.totalorder %s1017_s25, %s1383_s4 }
 0x20a   : > { %p1024_p6 = scmp.lt.s32.totalorder %s1022_s1, %s1018_s26 }
 0x20b   : > { %p1020_p8 = pnand %p1019_p0, %p1165_p11 }
 0x20c   : > { %p1025_p13 = por %p1024_p6, %p1023_p1 }
 0x20d   : > { %p1021_p10 = pneg %p1020_p8 }
 0x20f   : > { %p1026_p2 = pnand %p1025_p13, %p1021_p10 }
 0x27c   : > { %v492_v48 = vpop.f32.mrf.mxu2 }
 0x27d   : > { %515 = vst.msk [vmem:[%s371_s13] sm:$0xff] %vm400_vm0, %v492_v48 }
 0x284   : > { %v494_v49 = vpop.f32.mrf.mxu2  ;;  %v511_v50 = vpop.f32.mrf.mxu3 }
 0x285   : > { %516 = vst.msk [vmem:[%s371_s13 + $0x8] sm:$0xff] %vm400_vm0, %v511_v50 }
 0x286   : > { %1029 = shalt.err (!%p1026_p2)
}
 0x287   : > { %781 = dma.vmem_to_hbm [thread:$0]  (%p1165_p11), %s538_s23, 256, %s540_s27, %s520_s17, %s1087_s11, %s1087_s11, %s1088_s8  }
 0x28c   : > { %v513_v51 = vpop.f32.mrf.mxu3 }
 0x28d PF: > { %s571_s12 = sand.u32 1, %s1068_s18   ;;  %p799_p3 = pnand %p731_p9, %p1169_p12 }
 0x28e   : > { %s572_s0 = scalar_lea.sflag [#allocation4], %s571_s12 }
 0x28f   : > { %p800_p4 = pneg %p799_p3 }
 0x291   : > { %1059 = dma.done.wait (%p800_p4), %s572_s0, 256  }
 0x292   : > { %1061 = vsyncadd (%p800_p4), %s572_s0, 4294967040  ;;  %s582_s30 = scalar_lea.sflag [#allocation12], %s571_s12 }
 0x293   : > { %1063 = dma.done.wait (%p800_p4), %s582_s30, 256  }
 0x294   : > { %1065 = vsyncadd (%p800_p4), %s582_s30, 4294967040  ;;  %s1406_s21 = sld [smem:[#allocation19_spill]]  ;;  %s1409_s18 = smov %s1072_s19 }
 0x295   : > { %s1407_s29 = sld [smem:[#allocation18_spill]] }
 0x296   : > { %s1408_s20 = sld [smem:[#allocation20_spill]] }
 0x29a   : > { %p28_p11 = scmp.ge.s32.totalorder %s1406_s21, 4  }
 0x29b   : > { %s1410_s19 = smov %s1407_s29 }
 0x29c   :  { %30 = sbr.rel (!%p28_p11) target bundleno = 14 (0xe), region = 135 }
 0x2a1   :  { %588 = vsyncpa [#allocation3], 1 }
 0x2a2   :  { %590 = vsyncpa [#allocation3 + $0x1], 1 }
 0x2a3   :  { %591 = vsyncpa [#allocation6], 1 }
 0x2a4   :  { %593 = vsyncpa [#allocation6 + $0x1], 1 }
 0x2a5   :  { %594 = vsyncpa [#allocation9], 1 }
 0x2a6   :  { %596 = vsyncpa [#allocation9 + $0x1], 1 }
 0x2a7   :  { %597 = vsyncpa [#allocation4], 1 }
 0x2a8   :  { %599 = vsyncpa [#allocation4 + $0x1], 1 }
 0x2a9   :  { %600 = vsyncpa [#allocation12], 1 }
 0x2aa   :  { %602 = vsyncpa [#allocation12 + $0x1], 1 }

</bundles_post_ra>
